<compile_context>
chip_gen: v6e
topology: v6e:2x2x1
jax: 0.10.0
libtpu: 0.0.40
codegen_flags: <defaults>
</compile_context>

<pallas_src>
import functools
import math

import jax
import jax.numpy as jnp
from jax.experimental import pallas as pl
from jax.experimental.pallas import tpu as pltpu

EPS = 1e-5

# VMEM devoted to double-buffered (input + output) row tiles.
_TILE_VMEM_BUDGET = 8 * 1024 * 1024
# Scoped VMEM limit: above the 16/32 MiB defaults, below v7x's 64 MiB physical.
_VMEM_LIMIT_BYTES = 40 * 1024 * 1024
_MAX_ROW_TILE = 8192
# Largest packed lane width we accept (lcm(C, 128) in {128, 384}); beyond this the
# segmented-sum matmuls would push past the HBM roofline on v5e/v7x.
_MAX_PACK_WIDTH = 384


def _choose_row_tile(n_rows, width, in_bytes, out_bytes):
    """Largest row tile fitting the VMEM budget (double-buffered in + out)."""
    if n_rows <= 32:
        return n_rows  # tiny input: one full block
    per_row = width * (in_bytes + out_bytes) * 2  # x2: double buffering
    t = max(1, _TILE_VMEM_BUDGET // per_row)
    t = min(t, _MAX_ROW_TILE, n_rows)
    # Keep >= ~4 grid steps when there is enough work so the (parallel) row axis
    # can still be sharded across v7x's two TensorCores.
    if n_rows >= 4 * 256:
        t = min(t, pl.cdiv(n_rows, 4))
    # Multiple of 32 rows: satisfies sublane packing for f32(8)/bf16(16)/int8(32).
    t = max(32, (t // 32) * 32)
    return t


def _ln_rowwise_kernel(x_ref, w_ref, o_ref):
    # x_ref: (T, C), w_ref: (1, C), o_ref: (T, C); normalize over the last axis.
    x = x_ref[...].astype(jnp.float32)
    mu = jnp.mean(x, axis=-1, keepdims=True)
    xc = x - mu
    var = jnp.mean(xc * xc, axis=-1, keepdims=True)   # two-pass: no cancellation
    inv = jax.lax.rsqrt(var + EPS)
    w = w_ref[...].astype(jnp.float32)
    o_ref[...] = (x * inv * w).astype(o_ref.dtype)


def _ln_packed_kernel(x_ref, w_ref, s_ref, o_ref, *, inv_c, split_input):
    # Lane-dense path: k = W // C original rows packed along the lane axis.
    #   x_ref: (T, W)   w_ref: (1, W) (weight tiled k times)
    #   s_ref: (W, W)   bf16 block-diagonal sum matrix, S[i, j] = 1 iff i//C == j//C.
    # x @ S leaves, in every lane, the sum over that lane's own C-wide segment:
    # segmented reduce + broadcast in one MXU op (MXU is otherwise idle here), no
    # cross-lane shuffles, no masked partial stores.  f32 operands are split into
    # (hi, lo) bf16 halves -> two exact single-pass matmuls per moment (~f32 accurate
    # since the 0/1 RHS is exact in bf16).
    x = x_ref[...].astype(jnp.float32)
    s = s_ref[...]

    x_hi = x.astype(jnp.bfloat16)
    sum1 = jnp.dot(x_hi, s, preferred_element_type=jnp.float32)
    if split_input:  # input has >bf16 mantissa: add the low half
        x_lo = (x - x_hi.astype(jnp.float32)).astype(jnp.bfloat16)
        sum1 = sum1 + jnp.dot(x_lo, s, preferred_element_type=jnp.float32)
    mu = sum1 * inv_c

    xc = x - mu
    sq = xc * xc
    sq_hi = sq.astype(jnp.bfloat16)
    sq_lo = (sq - sq_hi.astype(jnp.float32)).astype(jnp.bfloat16)
    sum2 = (jnp.dot(sq_hi, s, preferred_element_type=jnp.float32)
            + jnp.dot(sq_lo, s, preferred_element_type=jnp.float32))
    var = jnp.maximum(sum2 * inv_c, 0.0)

    inv = jax.lax.rsqrt(var + EPS)
    w = w_ref[...].astype(jnp.float32)
    o_ref[...] = (x * inv * w).astype(o_ref.dtype)


def biasfree_layernorm(x, weight, *, row_tile=None):
    """x: (..., C); weight: (C,). Returns same shape/dtype as x."""
    C = x.shape[-1]
    assert weight.shape == (C,)
    lead = x.shape[:-1]
    rows = int(math.prod(lead)) if lead else 1
    if rows == 0:
        return x
    x2d = x.reshape(rows, C)

    in_bytes = jnp.dtype(x.dtype).itemsize
    out_bytes = in_bytes

    compiler_params = pltpu.CompilerParams(
        dimension_semantics=("parallel",),
        vmem_limit_bytes=_VMEM_LIMIT_BYTES,
    )

    # Lane-dense packing: fold k = lcm(C, 128) // C consecutive rows into one
    # lane-aligned packed row (free row-major reshape).  Normalization stays
    # strictly per original row via the segmented reduction in the kernel.
    width = (C * 128) // math.gcd(C, 128)   # lcm(C, 128)
    k = width // C
    if k > 1 and width <= _MAX_PACK_WIDTH and rows % k == 0:
        rows_p = rows // k
        xp = x2d.reshape(rows_p, width)
        w_row = jnp.tile(weight, k).reshape(1, width)
        seg = jnp.arange(width, dtype=jnp.int32) // C
        seg_sum = (seg[:, None] == seg[None, :]).astype(jnp.bfloat16)

        t = row_tile if row_tile is not None else _choose_row_tile(
            rows_p, width, in_bytes, out_bytes)
        kernel = functools.partial(
            _ln_packed_kernel, inv_c=1.0 / float(C), split_input=in_bytes > 2)
        out = pl.pallas_call(
            kernel,
            out_shape=jax.ShapeDtypeStruct((rows_p, width), x.dtype),
            grid_spec=pltpu.PrefetchScalarGridSpec(
                num_scalar_prefetch=0,
                grid=(pl.cdiv(rows_p, t),),
                in_specs=[
                    pl.BlockSpec((t, width), lambda i: (i, 0)),
                    pl.BlockSpec((1, width), lambda i: (0, 0)),
                    pl.BlockSpec((width, width), lambda i: (0, 0)),
                ],
                out_specs=pl.BlockSpec((t, width), lambda i: (i, 0)),
            ),
            compiler_params=compiler_params,
        )(xp, w_row, seg_sum)
        return out.reshape(rows, C).reshape(x.shape)

    # Generic per-row path (C multiple of 128, or lcm(C,128) too wide, or rows
    # not divisible by the packing factor).
    t = row_tile if row_tile is not None else _choose_row_tile(
        rows, C, in_bytes, out_bytes)
    out = pl.pallas_call(
        _ln_rowwise_kernel,
        out_shape=jax.ShapeDtypeStruct((rows, C), x.dtype),
        grid_spec=pltpu.PrefetchScalarGridSpec(
            num_scalar_prefetch=0,
            grid=(pl.cdiv(rows, t),),
            in_specs=[
                pl.BlockSpec((t, C), lambda i: (i, 0)),
                pl.BlockSpec((1, C), lambda i: (0, 0)),
            ],
            out_specs=pl.BlockSpec((t, C), lambda i: (i, 0)),
        ),
        compiler_params=compiler_params,
    )(x2d, weight.reshape(1, C))
    return out.reshape(x.shape)


def biasfree_layernorm_ref(x, weight):
    x32 = x.astype(jnp.float32)
    var = jnp.var(x32, axis=-1, keepdims=True)  # population variance (unbiased=False)
    return (x32 / jnp.sqrt(var + EPS) * weight.astype(jnp.float32)).astype(x.dtype)


if __name__ == "__main__":
    key = jax.random.PRNGKey(0)
    cases = [
        ((2, 64, 48), jnp.float32),    # lcm packing: width 384, k = 8 (Restormer C=48)
        ((2, 64, 64), jnp.float32),    # packing:     width 128, k = 2
        ((2, 7, 100), jnp.float32),    # generic row-wise fallback path
        ((2, 64, 48), jnp.bfloat16),   # low-precision storage dtype
    ]
    for shape, dt in cases:
        key, kx, kw = jax.random.split(key, 3)
        C = shape[-1]
        # Non-zero mean stresses the variance numerics (var << E[x^2]).
        x = (3.0 + 0.5 * jax.random.normal(kx, shape, dtype=jnp.float32)).astype(dt)
        w = (0.5 + jax.random.uniform(kw, (C,), dtype=jnp.float32)).astype(dt)

        out = jax.block_until_ready(biasfree_layernorm(x, w))
        ref = biasfree_layernorm_ref(x, w)

        assert out.shape == x.shape and out.dtype == x.dtype
        tol = 1e-4 if dt == jnp.float32 else 1e-2
        o32 = out.astype(jnp.float32)
        r32 = ref.astype(jnp.float32)
        max_err = float(jnp.max(jnp.abs(o32 - r32)))
        assert jnp.allclose(o32, r32, atol=tol, rtol=tol), (shape, str(dt), max_err)
    print("KERNEL_OK")
</pallas_src>

<mosaic_0001>
module attributes {stable_mosaic.version = 11 : i64} {
  func.func @_ln_packed_kernel(%arg0: i32, %arg1: memref<16x384xf32, #tpu.memory_space<vmem>>, %arg2: memref<1x384xf32, #tpu.memory_space<vmem>>, %arg3: memref<384x384xbf16, #tpu.memory_space<vmem>>, %arg4: memref<16x384xf32, #tpu.memory_space<vmem>>) attributes {dimension_semantics = [#tpu.dimension_semantics<parallel>], iteration_bounds = array<i64: 1>, scalar_prefetch = 0 : i64, scratch_operands = 0 : i64, tpu.core_type = #tpu.core_type<tc>, window_params = [{transform_indices = @transform_0, window_bounds = array<i64: 16, 384>}, {pipeline_mode = #tpu.pipeline_mode<synchronous>, transform_indices = @transform_1, window_bounds = array<i64: 1, 384>}, {pipeline_mode = #tpu.pipeline_mode<synchronous>, transform_indices = @transform_2, window_bounds = array<i64: 384, 384>}, {transform_indices = @transform_3, window_bounds = array<i64: 16, 384>}]} {
    %c0 = arith.constant 0 : index
    %c0_0 = arith.constant 0 : index
    %0 = vector.load %arg1[%c0, %c0_0] : memref<16x384xf32, #tpu.memory_space<vmem>>, vector<16x384xf32>
    %c0_1 = arith.constant 0 : index
    %c0_2 = arith.constant 0 : index
    %1 = vector.load %arg3[%c0_1, %c0_2] : memref<384x384xbf16, #tpu.memory_space<vmem>>, vector<384x384xbf16>
    %2 = arith.truncf %0 : vector<16x384xf32> to vector<16x384xbf16>
    %cst = arith.constant dense<0.000000e+00> : vector<16x384xf32>
    %3 = tpu.matmul %2, %1, %cst {dimension_numbers = #tpu.dot_dimension_numbers<[1], [0], [0], [1], [0, 0, 1, 1], [], []>} : vector<16x384xbf16>, vector<384x384xbf16>, vector<16x384xf32> -> vector<16x384xf32>
    %4 = arith.extf %2 : vector<16x384xbf16> to vector<16x384xf32>
    %5 = arith.subf %0, %4 : vector<16x384xf32>
    %6 = arith.truncf %5 : vector<16x384xf32> to vector<16x384xbf16>
    %cst_3 = arith.constant dense<0.000000e+00> : vector<16x384xf32>
    %7 = tpu.matmul %6, %1, %cst_3 {dimension_numbers = #tpu.dot_dimension_numbers<[1], [0], [0], [1], [0, 0, 1, 1], [], []>} : vector<16x384xbf16>, vector<384x384xbf16>, vector<16x384xf32> -> vector<16x384xf32>
    %8 = arith.addf %3, %7 : vector<16x384xf32>
    %cst_4 = arith.constant 0.020833334 : f32
    %9 = vector.broadcast %cst_4 : f32 to vector<16x384xf32>
    %10 = arith.mulf %8, %9 : vector<16x384xf32>
    %11 = arith.subf %0, %10 : vector<16x384xf32>
    %12 = arith.mulf %11, %11 : vector<16x384xf32>
    %13 = arith.truncf %12 : vector<16x384xf32> to vector<16x384xbf16>
    %14 = arith.extf %13 : vector<16x384xbf16> to vector<16x384xf32>
    %15 = arith.subf %12, %14 : vector<16x384xf32>
    %16 = arith.truncf %15 : vector<16x384xf32> to vector<16x384xbf16>
    %cst_5 = arith.constant dense<0.000000e+00> : vector<16x384xf32>
    %17 = tpu.matmul %13, %1, %cst_5 {dimension_numbers = #tpu.dot_dimension_numbers<[1], [0], [0], [1], [0, 0, 1, 1], [], []>} : vector<16x384xbf16>, vector<384x384xbf16>, vector<16x384xf32> -> vector<16x384xf32>
    %cst_6 = arith.constant dense<0.000000e+00> : vector<16x384xf32>
    %18 = tpu.matmul %16, %1, %cst_6 {dimension_numbers = #tpu.dot_dimension_numbers<[1], [0], [0], [1], [0, 0, 1, 1], [], []>} : vector<16x384xbf16>, vector<384x384xbf16>, vector<16x384xf32> -> vector<16x384xf32>
    %19 = arith.addf %17, %18 : vector<16x384xf32>
    %cst_7 = arith.constant 0.020833334 : f32
    %20 = vector.broadcast %cst_7 : f32 to vector<16x384xf32>
    %21 = arith.mulf %19, %20 : vector<16x384xf32>
    %cst_8 = arith.constant 0.000000e+00 : f32
    %22 = vector.broadcast %cst_8 : f32 to vector<16x384xf32>
    %23 = arith.maximumf %21, %22 : vector<16x384xf32>
    %cst_9 = arith.constant 9.99999974E-6 : f32
    %24 = vector.broadcast %cst_9 : f32 to vector<16x384xf32>
    %25 = arith.addf %23, %24 : vector<16x384xf32>
    %26 = math.rsqrt %25 : vector<16x384xf32>
    %c0_10 = arith.constant 0 : index
    %c0_11 = arith.constant 0 : index
    %27 = vector.load %arg2[%c0_10, %c0_11] : memref<1x384xf32, #tpu.memory_space<vmem>>, vector<1x384xf32>
    %28 = arith.mulf %0, %26 : vector<16x384xf32>
    %29 = vector.broadcast %27 : vector<1x384xf32> to vector<16x384xf32>
    %30 = arith.mulf %28, %29 : vector<16x384xf32>
    %c0_12 = arith.constant 0 : index
    %c0_13 = arith.constant 0 : index
    %31 = vector.load %arg4[%c0_12, %c0_13] : memref<16x384xf32, #tpu.memory_space<vmem>>, vector<16x384xf32>
    tpu.vector_store %arg4[%c0_12, %c0_13], %30 {strides = array<i32>} : memref<16x384xf32, #tpu.memory_space<vmem>>, vector<16x384xf32>,
    return
  }
  func.func @transform_0(%arg0: i32) -> (i32, i32) {
    %c0_i32 = arith.constant 0 : i32
    %c0_i32_0 = arith.constant 0 : i32
    return %arg0, %c0_i32 : i32, i32
  }
  func.func @transform_1(%arg0: i32) -> (i32, i32) {
    %c0_i32 = arith.constant 0 : i32
    %c0_i32_0 = arith.constant 0 : i32
    %c0_i32_1 = arith.constant 0 : i32
    return %c0_i32, %c0_i32_0 : i32, i32
  }
  func.func @transform_2(%arg0: i32) -> (i32, i32) {
    %c0_i32 = arith.constant 0 : i32
    %c0_i32_0 = arith.constant 0 : i32
    %c0_i32_1 = arith.constant 0 : i32
    return %c0_i32, %c0_i32_0 : i32, i32
  }
  func.func @transform_3(%arg0: i32) -> (i32, i32) {
    %c0_i32 = arith.constant 0 : i32
    %c0_i32_0 = arith.constant 0 : i32
    return %arg0, %c0_i32 : i32, i32
  }
}

</mosaic_0001>

<bundles_post_ra>
// kernel: tpu_custom_call.1
= control target key start
LH: loop header
LB: loop body
LE: loop exit
PB: predicated region body
PF: predicated region fallthrough
CT: control target
= control target key end

     0   :  { %8 = vsyncpa [#allocation3], 0  ;;  %s2448_s0 = inlined_call_operand.hbm [shape: f32[16,384], index: 0, kind: input, shape index: {}]   ;;  %s2449_s1 = inlined_call_operand.hbm [shape: f32[1,384], index: 1, kind: input, shape index: {}]   ;;  %s2450_s2 = inlined_call_operand.hbm [shape: bf16[384,384], index: 2, kind: input, shape index: {}]   ;;  %s2451_s3 = inlined_call_operand.hbm [shape: f32[16,384], index: 3, kind: output, shape index: {}]  }
   0x1   :  { %9 = vsyncpa [#allocation6], 0 }
   0x2   :  { %10 = vsyncpa [#allocation4], 0  ;;  %s1848_s12 = smov [#allocation5]   ;;  %s1849_s14 = smov [#allocation2]  }
   0x3   :  { %s29_s13 = sshll.u32 %s1848_s12, 4  ;;  %s16_s15 = sshll.u32 %s1849_s14, 4  ;;  %s30_s13 = int_to_ptr.vmem [resolvable:$true] %s29_s13  ;;  %s17_s15 = int_to_ptr.vmem [resolvable:$true] %s16_s15 }
   0x4   :  { %s1770_s16 = scalar_lea.vmem %s30_s13, 48  ;;  %s1774_s17 = scalar_lea.vmem %s30_s13, 64 }
   0x5   :  { %p1771_p0 = scmp.ne.s32.totalorder %s30_s13, %s1770_s16  ;;  %p1775_p1 = scmp.lt.s32.totalorder %s30_s13, %s30_s13 }
   0x6   :  { %p1776_p2 = scmp.lt.s32.totalorder %s1774_s17, %s1770_s16 }
   0x8   :  { %p1777_p3 = por %p1776_p2, %p1775_p1 }
   0xa   :  { %p1778_p4 = pnand %p1777_p3, %p1771_p0 }
   0xc   :  { %1781 = shalt.err (!%p1778_p4)
}
   0xd   :  { %32 = dma.hbm_to_vmem [thread:$0]  %s2449_s1, 48, %s30_s13, [#allocation6]  }
   0xe   :  { %s1790_s20 = scalar_lea.vmem %s17_s15, 768  ;;  %p1795_p6 = scmp.lt.s32.totalorder %s17_s15, %s17_s15 }
   0xf   :  { %p1791_p5 = scmp.ne.s32.totalorder %s17_s15, %s1790_s20  ;;  %p1796_p7 = scmp.lt.s32.totalorder %s1790_s20, %s1790_s20 }
  0x11   :  { %p1797_p8 = por %p1796_p7, %p1795_p6 }
  0x13   :  { %p1798_p9 = pnand %p1797_p8, %p1791_p5 }
  0x15   :  { %1801 = shalt.err (!%p1798_p9)
}
  0x16   :  { %s1850_s21 = smov 384   ;;  %s1851_s22 = smov 24  }
  0x17   :  { %22 = dma.hbm_to_vmem [thread:$0]  %s2448_s0, 768, %s17_s15, [#allocation3], %s1850_s21, %s1850_s21, %s1851_s22  }
  0x18   :  { %s1852_s25 = smov [#allocation7]  }
  0x19   :  { %s38_s26 = sshll.u32 %s1852_s25, 4  ;;  %s39_s26 = int_to_ptr.vmem [resolvable:$true] %s38_s26 }
  0x1a   :  { %s1810_s1 = scalar_lea.vmem %s39_s26, 9216  ;;  %p1815_p11 = scmp.lt.s32.totalorder %s39_s26, %s39_s26 }
  0x1b   :  { %p1811_p10 = scmp.ne.s32.totalorder %s39_s26, %s1810_s1  ;;  %p1816_p12 = scmp.lt.s32.totalorder %s1810_s1, %s1810_s1 }
  0x1d   :  { %p1817_p13 = por %p1816_p12, %p1815_p11 }
  0x1f   :  { %p1818_p0 = pnand %p1817_p13, %p1811_p10 }
  0x21   :  { %1821 = shalt.err (!%p1818_p0)
}
  0x22   :  { %s1853_s27 = smov 192   ;;  %s1854_s28 = smov 12  }
  0x23   :  { %44 = dma.hbm_to_vmem [thread:$0]  %s2450_s2, 9216, %s39_s26, [#allocation6], %s1853_s27, %s1853_s27, %s1854_s28  }
  0x24   :  { %1842 = dma.done.wait [#allocation3], 768  }
  0x25   :  { %1843 = vsyncadd [#allocation3], 4294966528 }
  0x26   :  { %1844 = dma.done.wait [#allocation6], 9264  }
  0x27   :  { %1845 = vsyncadd [#allocation6], 4294958032  ;;  %v2452_v0 = vmov 0   ;;  %v1892_v1 = vld [vmem:[#allocation7 + $0xac] ss:$12 sps:$4 sm:$0xff]   ;;  %v1972_v30 = vld [vmem:[#allocation2 + $0x10] sm:$0xff] }
  0x28   :  { %634 = vmatprep.mubr.bf16.mxu1 %v2452_v0  ;;  %v1894_v2 = vld [vmem:[#allocation7 + $0x22c] ss:$12 sps:$4 sm:$0xff]   ;;  %559 = vmatprep.subr.bf16.mxu0 %v1892_v1  ;;  %v1897_v3 = vld [vmem:[#allocation7 + $0xa8] ss:$12 sps:$4 sm:$0xff]   ;;  %v1908_v7 = vld [vmem:[#allocation7 + $0x90] ss:$12 sps:$4 sm:$0xff]  }
  0x29   :  { %v1899_v4 = vld [vmem:[#allocation7 + $0x228] ss:$12 sps:$4 sm:$0xff]   ;;  %602 = vmatprep.subr.bf16.mxu1 %v1894_v2  ;;  %560 = vmatpush1.bf16.msra.mxu0 %v1897_v3  ;;  %v1911_v8 = vld [vmem:[#allocation7 + $0x210] ss:$12 sps:$4 sm:$0xff]   ;;  %v1918_v11 = vld [vmem:[#allocation7 + $0x78] ss:$12 sps:$4 sm:$0xff]  }
  0x2a   :  { %v1902_v5 = vld [vmem:[#allocation7 + $0x94] ss:$12 sps:$4 sm:$0xff]   ;;  %603 = vmatpush1.bf16.msra.mxu1 %v1899_v4  ;;  %v1914_v9 = vld [vmem:[#allocation7 + $0x7c] ss:$12 sps:$4 sm:$0xff]   ;;  %v1920_v12 = vld [vmem:[#allocation7 + $0x1f8] ss:$12 sps:$4 sm:$0xff]  }
  0x2b   :  { %v1906_v6 = vld [vmem:[#allocation7 + $0x214] ss:$12 sps:$4 sm:$0xff]   ;;  %561 = vmatprep.subr.bf16.mxu0 %v1902_v5  ;;  %v1916_v10 = vld [vmem:[#allocation7 + $0x1fc] ss:$12 sps:$4 sm:$0xff]   ;;  %v1924_v13 = vld [vmem:[#allocation7 + $0x64] ss:$12 sps:$4 sm:$0xff]  }
  0x2c   :  { %604 = vmatprep.subr.bf16.mxu1 %v1906_v6  ;;  %v1928_v14 = vld [vmem:[#allocation7 + $0x1e4] ss:$12 sps:$4 sm:$0xff]   ;;  %v1930_v15 = vld [vmem:[#allocation7 + $0x60] ss:$12 sps:$4 sm:$0xff]   ;;  %v1942_v19 = vld [vmem:[#allocation7 + $0x48] ss:$12 sps:$4 sm:$0xff]  }
  0x2d   :  { %562 = vmatpush1.bf16.msra.mxu0 %v1908_v7  ;;  %v1934_v16 = vld [vmem:[#allocation7 + $0x1e0] ss:$12 sps:$4 sm:$0xff]   ;;  %v1944_v20 = vld [vmem:[#allocation7 + $0x1c8] ss:$12 sps:$4 sm:$0xff]   ;;  %v1954_v23 = vld [vmem:[#allocation7 + $0x30] ss:$12 sps:$4 sm:$0xff]  }
  0x2e   :  { %605 = vmatpush1.bf16.msra.mxu1 %v1911_v8  ;;  %563 = vmatprep.subr.bf16.mxu0 %v1914_v9  ;;  %v1936_v17 = vld [vmem:[#allocation7 + $0x4c] ss:$12 sps:$4 sm:$0xff]   ;;  %v1948_v21 = vld [vmem:[#allocation7 + $0x34] ss:$12 sps:$4 sm:$0xff]   ;;  %v1958_v24 = vld [vmem:[#allocation7 + $0x1b0] ss:$12 sps:$4 sm:$0xff]  }
  0x2f   :  { %606 = vmatprep.subr.bf16.mxu1 %v1916_v10  ;;  %v1940_v18 = vld [vmem:[#allocation7 + $0x1cc] ss:$12 sps:$4 sm:$0xff]   ;;  %v1952_v22 = vld [vmem:[#allocation7 + $0x1b4] ss:$12 sps:$4 sm:$0xff]   ;;  %v1960_v25 = vld [vmem:[#allocation7 + $0x1c] ss:$12 sps:$4 sm:$0xff]  }
  0x30   :  { %v1964_v26 = vld [vmem:[#allocation7 + $0x19c] ss:$12 sps:$4 sm:$0xff]   ;;  %v1966_v27 = vld [vmem:[#allocation7 + $0x18] ss:$12 sps:$4 sm:$0xff]   ;;  %2520 = vst [vmem:[#allocation14_spill] sm:$0xff] %v1972_v30  ;;  %vm1857_vm0 = vmmov 0  }
  0x31   :  { %564 = vmatpush1.bf16.msra.mxu0 %v1918_v11  ;;  %2518 = vst [vmem:[#allocation12_spill] sm:$0xff] %v1966_v27  ;;  %v1968_v28 = vld [vmem:[#allocation7 + $0x198] ss:$12 sps:$4 sm:$0xff]   ;;  %v1986_v34 = vld [vmem:[#allocation7] ss:$12 sps:$4 sm:$0xff]   ;;  %s1858_s0 = smov [#allocation8]  }
  0x32   :  { %607 = vmatpush1.bf16.msra.mxu1 %v1920_v12  ;;  %565 = vmatprep.subr.bf16.mxu0 %v1924_v13  ;;  %v1970_v29 = vld [vmem:[#allocation7 + $0x4] ss:$12 sps:$4 sm:$0xff]   ;;  %v1976_v31 = vld [vmem:[#allocation2 + $0x28] sm:$0xff]  ;;  %2523 = vst [vmem:[#allocation17_spill] sm:$0xff] %v1986_v34  ;;  %v1988_v35 = vld [vmem:[#allocation7 + $0x180] ss:$12 sps:$4 sm:$0xff]  }
  0x33   :  { %608 = vmatprep.subr.bf16.mxu1 %v1928_v14  ;;  %2519 = vst [vmem:[#allocation13_spill] sm:$0xff] %v1970_v29  ;;  %2521 = vst [vmem:[#allocation15_spill] sm:$0xff] %v1976_v31  ;;  %v1980_v32 = vld [vmem:[#allocation7 + $0x184] ss:$12 sps:$4 sm:$0xff]   ;;  %v1984_v33 = vpack.c.bf16 %v1976_v31, %v1972_v30  ;;  %v1994_v38 = vld [vmem:[#allocation7 + $0x16c] ss:$12 sps:$4 sm:$0xff]  }
  0x34   :  { %2524 = vst [vmem:[#allocation18_spill] sm:$0xff] %v1994_v38  ;;  %v1998_v39 = vld [vmem:[#allocation7 + $0x170] ss:$12 sps:$4 sm:$0xff]   ;;  %v2002_v42 = vld [vmem:[#allocation7 + $0x168] ss:$12 sps:$4 sm:$0xff]   ;;  %s1331_s2 = sshll.u32 %s1858_s0, 4  ;;  %s1332_s2 = int_to_ptr.vmem [resolvable:$true] %s1331_s2 }
  0x35   :  { %566 = vmatpush1.bf16.msra.mxu0 %v1930_v15  ;;  %2522 = vst [vmem:[#allocation16_spill] sm:$0xff] %v1984_v33  ;;  %v162_v36 = vunpack.c.l.bf16 %v1984_v33  ;;  %v165_v37 = vunpack.c.h.bf16 %v1984_v33  ;;  %2525 = vst [vmem:[#allocation19_spill] sm:$0xff] %v1998_v39  ;;  %v2006_v44 = vld [vmem:[#allocation7 + $0xb0] ss:$12 sps:$4 sm:$0xff]   ;;  %v2010_v45 = vld [vmem:[#allocation7 + $0x154] ss:$12 sps:$4 sm:$0xff]   ;;  %p1827_p2 = scmp.lt.s32.totalorder %s1332_s2, %s1332_s2 }
  0x36   :  { %609 = vmatpush1.bf16.msra.mxu1 %v1934_v16  ;;  %567 = vmatprep.subr.bf16.mxu0 %v1936_v17  ;;  %2526 = vst [vmem:[#allocation20_spill] sm:$0xff] %v2002_v42  ;;  %2527 = vst [vmem:[#allocation21_spill] sm:$0xff] %v2006_v44  ;;  %v2014_v46 = vld [vmem:[#allocation7 + $0x158] ss:$12 sps:$4 sm:$0xff]   ;;  %v2017_v47 = vld [vmem:[#allocation7 + $0x150] ss:$12 sps:$4 sm:$0xff]  }
  0x37   :  { %610 = vmatprep.subr.bf16.mxu1 %v1940_v18  ;;  %v168_v40 = vsub.f32 %v1972_v30, %v162_v36  ;;  %v171_v41 = vsub.f32 %v1976_v31, %v165_v37  ;;  %2528 = vst [vmem:[#allocation22_spill] sm:$0xff] %v2010_v45  ;;  %2529 = vst [vmem:[#allocation23_spill] sm:$0xff] %v2014_v46  ;;  %v2021_v48 = vld [vmem:[#allocation7 + $0x98] ss:$12 sps:$4 sm:$0xff]   ;;  %v2025_v49 = vld [vmem:[#allocation7 + $0x13c] ss:$12 sps:$4 sm:$0xff]  }
  0x38   :  { %2530 = vst [vmem:[#allocation24_spill] sm:$0xff] %v2017_v47  ;;  %2531 = vst [vmem:[#allocation25_spill] sm:$0xff] %v2021_v48  ;;  %v2027_v50 = vld [vmem:[#allocation7 + $0x140] ss:$12 sps:$4 sm:$0xff]   ;;  %v2029_v51 = vld [vmem:[#allocation7 + $0x138] ss:$12 sps:$4 sm:$0xff]  }
  0x39   :  { %568 = vmatpush1.bf16.msra.mxu0 %v1942_v19  ;;  %v2004_v43 = vpack.c.bf16 %v171_v41, %v168_v40  ;;  %2532 = vst [vmem:[#allocation26_spill] sm:$0xff] %v2025_v49  ;;  %2533 = vst [vmem:[#allocation27_spill] sm:$0xff] %v2027_v50  ;;  %v2033_v52 = vld [vmem:[#allocation7 + $0x80] ss:$12 sps:$4 sm:$0xff]   ;;  %v2035_v53 = vld [vmem:[#allocation7 + $0x124] ss:$12 sps:$4 sm:$0xff]  }
  0x3a   :  { %611 = vmatpush1.bf16.msra.mxu1 %v1944_v20  ;;  %569 = vmatprep.subr.bf16.mxu0 %v1948_v21  ;;  %2534 = vst [vmem:[#allocation28_spill] sm:$0xff] %v2029_v51  ;;  %2535 = vst [vmem:[#allocation29_spill] sm:$0xff] %v2033_v52  ;;  %v2039_v54 = vld [vmem:[#allocation7 + $0x128] ss:$12 sps:$4 sm:$0xff]   ;;  %v2041_v55 = vld [vmem:[#allocation7 + $0x120] ss:$12 sps:$4 sm:$0xff]  }
  0x3b   :  { %612 = vmatprep.subr.bf16.mxu1 %v1952_v22  ;;  %2536 = vst [vmem:[#allocation30_spill] sm:$0xff] %v2035_v53  ;;  %2537 = vst [vmem:[#allocation31_spill] sm:$0xff] %v2039_v54  ;;  %v2043_v56 = vld [vmem:[#allocation7 + $0x68] ss:$12 sps:$4 sm:$0xff]   ;;  %v2047_v57 = vld [vmem:[#allocation7 + $0x10c] ss:$12 sps:$4 sm:$0xff]  }
  0x3c   :  { %2538 = vst [vmem:[#allocation32_spill] sm:$0xff] %v2041_v55  ;;  %2539 = vst [vmem:[#allocation33_spill] sm:$0xff] %v2043_v56  ;;  %v2051_v58 = vld [vmem:[#allocation7 + $0x110] ss:$12 sps:$4 sm:$0xff]   ;;  %v2053_v59 = vld [vmem:[#allocation7 + $0x108] ss:$12 sps:$4 sm:$0xff]  }
  0x3d   :  { %570 = vmatpush1.bf16.msra.mxu0 %v1954_v23  ;;  %2540 = vst [vmem:[#allocation34_spill] sm:$0xff] %v2047_v57  ;;  %2541 = vst [vmem:[#allocation35_spill] sm:$0xff] %v2051_v58  ;;  %v2055_v60 = vld [vmem:[#allocation7 + $0x50] ss:$12 sps:$4 sm:$0xff]   ;;  %v2057_v61 = vld [vmem:[#allocation7 + $0xf4] ss:$12 sps:$4 sm:$0xff]  }
  0x3e   :  { %613 = vmatpush1.bf16.msra.mxu1 %v1958_v24  ;;  %571 = vmatprep.subr.bf16.mxu0 %v1960_v25  ;;  %2542 = vst [vmem:[#allocation36_spill] sm:$0xff] %v2053_v59  ;;  %2543 = vst [vmem:[#allocation37_spill] sm:$0xff] %v2055_v60  ;;  %v2061_v62 = vld [vmem:[#allocation7 + $0xf8] ss:$12 sps:$4 sm:$0xff]   ;;  %v2067_v36 = vld [vmem:[#allocation2 + $0x20] sm:$0xff]  ;;  %s1822_s4 = scalar_lea.vmem %s1332_s2, 768 }
  0x3f   :  { %614 = vmatprep.subr.bf16.mxu1 %v1964_v26  ;;  %2544 = vst [vmem:[#allocation38_spill] sm:$0xff] %v2057_v61  ;;  %2545 = vst [vmem:[#allocation39_spill] sm:$0xff] %v2061_v62  ;;  %v2063_v63 = vld [vmem:[#allocation2 + $0x8] sm:$0xff]  ;;  %v2069_v37 = vld [vmem:[#allocation2] sm:$0xff]  ;;  %p1823_p1 = scmp.ne.s32.totalorder %s1332_s2, %s1822_s4  ;;  %p1828_p3 = scmp.lt.s32.totalorder %s1822_s4, %s1822_s4 }
  0x40   :  { %2546 = vst [vmem:[#allocation40_spill] sm:$0xff] %v2063_v63  ;;  %2547 = vst [vmem:[#allocation41_spill] sm:$0xff] %v2067_v36  ;;  %v2071_v40 = vld [vmem:[#allocation2 + $0x18] sm:$0xff]  ;;  %v2073_v41 = vld [vmem:[#allocation7 + $0xf0] ss:$12 sps:$4 sm:$0xff]   ;;  %v2077_v0 = vpack.c.bf16 %v2067_v36, %v2063_v63 }
  0x41   :  { %572 = vmatpush1.bf16.msra.mxu0 %v1966_v27  ;;  %2548 = vst [vmem:[#allocation42_spill] sm:$0xff] %v2069_v37  ;;  %2549 = vst [vmem:[#allocation43_spill] sm:$0xff] %v2071_v40  ;;  %v2079_v31 = vld [vmem:[#allocation7 + $0x38] ss:$12 sps:$4 sm:$0xff]   ;;  %v2083_v30 = vpack.c.bf16 %v2071_v40, %v2069_v37  ;;  %p1829_p4 = por %p1828_p3, %p1827_p2 }
  0x42   :  { %615 = vmatpush1.bf16.msra.mxu1 %v1968_v28  ;;  %573 = vmatprep.subr.bf16.mxu0 %v1970_v29  ;;  %2550 = vst [vmem:[#allocation44_spill] sm:$0xff] %v2073_v41  ;;  %2551 = vst [vmem:[#allocation45_spill] sm:$0xff] %v2079_v31 }
  0x43   :  { %616 = vmatprep.subr.bf16.mxu1 %v1980_v32  ;;  %v163_v33 = vunpack.c.h.bf16 %v2083_v30  ;;  %p1830_p5 = pnand %p1829_p4, %p1823_p1 }
  0x45   :  { %574 = vmatpush1.bf16.msra.mxu0 %v1986_v34 }
  0x46   :  { %617 = vmatpush1.bf16.msra.mxu1 %v1988_v35  ;;  %575 = vmatprep.subr.bf16.mxu0 %v1994_v38 }
  0x47   :  { %1416 = vmatprep.subr.bf16.mxu1 %v1998_v39  ;;  %v2105_v39 = vld [vmem:[#allocation7 + $0xc4] ss:$12 sps:$4 sm:$0xff]  }
  0x48   :  { %2554 = vst [vmem:[#allocation48_spill] sm:$0xff] %v2105_v39 }
  0x49   :  { %635 = vmatmul.mubr.bf16.vlgmr.msra.gmra.mxu1 %v2004_v43  ;;  %576 = vmatpush2.bf16.msra.mxu0 %v2002_v42 }
  0x4a   :  { %1417 = vmatpush3.bf16.msra.mxu1 %v2006_v44  ;;  %577 = vmatprep.subr.bf16.mxu0 %v2010_v45  ;;  %v2099_v44 = vld [vmem:[#allocation7 + $0x20] ss:$12 sps:$4 sm:$0xff]  }
  0x4b   :  { %1418 = vmatprep.subr.bf16.mxu1 %v2014_v46 }
  0x4d   :  { %578 = vmatpush2.bf16.msra.mxu0 %v2017_v47 }
  0x4e   :  { %1419 = vmatpush3.bf16.msra.mxu1 %v2021_v48  ;;  %579 = vmatprep.subr.bf16.mxu0 %v2025_v49 }
  0x4f   :  { %1420 = vmatprep.subr.bf16.mxu1 %v2027_v50  ;;  %v2095_v50 = vld [vmem:[#allocation7 + $0xd8] ss:$12 sps:$4 sm:$0xff]  }
  0x50   :  { %2553 = vst [vmem:[#allocation47_spill] sm:$0xff] %v2095_v50 }
  0x51   :  { %580 = vmatpush2.bf16.msra.mxu0 %v2029_v51 }
  0x52   :  { %1421 = vmatpush3.bf16.msra.mxu1 %v2033_v52  ;;  %581 = vmatprep.subr.bf16.mxu0 %v2035_v53  ;;  %v2093_v52 = vld [vmem:[#allocation7 + $0xe0] ss:$12 sps:$4 sm:$0xff]  }
  0x53   :  { %1422 = vmatprep.subr.bf16.mxu1 %v2039_v54  ;;  %v164_v54 = vunpack.c.h.bf16 %v2077_v0 }
  0x55   :  { %582 = vmatpush2.bf16.msra.mxu0 %v2041_v55  ;;  %v170_v46 = vsub.f32 %v2067_v36, %v164_v54  ;;  %v169_v36 = vsub.f32 %v2071_v40, %v163_v33  ;;  %v2488_v33 = vmov 0.0   ;;  %v2162_v40 = vld [vmem:[#allocation7 + $0x1a0] ss:$12 sps:$4 sm:$0xff]  }
  0x56   :  { %1423 = vmatpush3.bf16.msra.mxu1 %v2043_v56  ;;  %583 = vmatprep.subr.bf16.mxu0 %v2047_v57  ;;  %v161_v56 = vunpack.c.l.bf16 %v2077_v0 }
  0x57   :  { %1424 = vmatprep.subr.bf16.mxu1 %v2051_v58  ;;  %v2087_v58 = vld [vmem:[#allocation7 + $0xdc] ss:$12 sps:$4 sm:$0xff]  }
  0x58   :  { %2552 = vst [vmem:[#allocation46_spill] sm:$0xff] %v2087_v58  ;;  %v167_v48 = vsub.f32 %v2063_v63, %v161_v56  ;;  %v2109_v56 = vld [vmem:[#allocation7 + $0xc8] ss:$12 sps:$4 sm:$0xff]   ;;  %v2115_v63 = vld [vmem:[#allocation7 + $0xc0] ss:$12 sps:$4 sm:$0xff]  }
  0x59   :  { %584 = vmatpush2.bf16.msra.mxu0 %v2053_v59  ;;  %2555 = vst [vmem:[#allocation49_spill] sm:$0xff] %v2115_v63 }
  0x5a   :  { %1425 = vmatpush3.bf16.msra.mxu1 %v2055_v60  ;;  %585 = vmatprep.subr.bf16.mxu0 %v2057_v61  ;;  %v160_v60 = vunpack.c.l.bf16 %v2083_v30 }
  0x5b   :  { %1426 = vmatprep.subr.bf16.mxu1 %v2061_v62  ;;  %v173_v62 = vpack.c.bf16 %v170_v46, %v167_v48  ;;  %v2123_v48 = vld [vmem:[#allocation7 + $0x230] ss:$12 sps:$4 sm:$0xff]  }
  0x5c   :  { %v166_v54 = vsub.f32 %v2069_v37, %v160_v60  ;;  %2556 = vst [vmem:[#allocation50_spill] sm:$0xff] %v2123_v48  ;;  %v2129_v60 = vld [vmem:[#allocation7 + $0x218] ss:$12 sps:$4 sm:$0xff]   ;;  %v2168_v37 = vld [vmem:[#allocation7 + $0x188] ss:$12 sps:$4 sm:$0xff]  }
  0x5d   :  { %586 = vmatpush2.bf16.msra.mxu0 %v2073_v41  ;;  %591 = vmatprep.mubr.bf16.mxu0 %v173_v62 }
  0x5e   :  { %1427 = vmatpush3.bf16.msra.mxu1 %v2079_v31  ;;  %587 = vmatprep.subr.bf16.mxu0 %v2087_v58  ;;  %v2117_v31 = vld [vmem:[#allocation7 + $0x8] ss:$12 sps:$4 sm:$0xff]   ;;  %v172_v46 = vpack.c.bf16 %v169_v36, %v166_v54  ;;  %v2150_v54 = vld [vmem:[#allocation7 + $0x1d0] ss:$12 sps:$4 sm:$0xff]  }
  0x5f   :  { %1428 = vmatprep.subr.bf16.mxu1 %v2093_v52  ;;  %677 = vmatprep.mubr.bf16.mxu1 %v173_v62  ;;  %v2138_v62 = vld [vmem:[#allocation7 + $0x200] ss:$12 sps:$4 sm:$0xff]   ;;  %v2144_v36 = vld [vmem:[#allocation7 + $0x1e8] ss:$12 sps:$4 sm:$0xff]  }
  0x61   :  { %588 = vmatpush2.bf16.msra.mxu0 %v2095_v50 }
  0x62   :  { %1429 = vmatpush3.bf16.msra.mxu1 %v2099_v44  ;;  %589 = vmatprep.subr.bf16.mxu0 %v2105_v39 }
  0x63   :  { %1430 = vmatprep.subr.bf16.mxu1 %v2109_v56 }
  0x65   :  { %590 = vmatpush2.bf16.msra.mxu0 %v2115_v63 }
  0x66   :  { %1431 = vmatpush3.bf16.msra.mxu1 %v2117_v31  ;;  %1540 = vmatprep.subr.bf16.mxu0 %v2488_v33 }
  0x67   :  { %727 = vmatprep.subr.bf16.mxu1 %v1892_v1 }
  0x68   :  { %592 = vmatmul.mubr.bf16.vlgmr.msra.gmra.mxu0 %v172_v46 }
  0x69   :  { %678 = vmatmul.mubr.bf16.vlgmr.msra.gmra.mxu1 %v172_v46  ;;  %1541 = vmatpush3.bf16.msra.mxu0 %v2123_v48  ;;  %v2156_v46 = vld [vmem:[#allocation7 + $0x1b8] ss:$12 sps:$4 sm:$0xff]  }
  0x6a   :  { %728 = vmatpush1.bf16.msra.mxu1 %v1897_v3  ;;  %1542 = vmatprep.subr.bf16.mxu0 %v2488_v33 }
  0x6b   :  { %729 = vmatprep.subr.bf16.mxu1 %v1902_v5  ;;  %1556 = vmatprep.mubr.msk.bf16.mxu0 %vm1857_vm0, %v2488_v33 }
  0x6c   :  { %759 = vmatprep.mubr.bf16.mxu1 %v2077_v0 }
  0x6d   :  { %1543 = vmatpush3.bf16.msra.mxu0 %v2129_v60 }
  0x6e   :  { %730 = vmatpush1.bf16.msra.mxu1 %v1908_v7  ;;  %1544 = vmatprep.subr.bf16.mxu0 %v2488_v33 }
  0x6f   :  { %731 = vmatprep.subr.bf16.mxu1 %v1914_v9 }
  0x71   :  { %1545 = vmatpush3.bf16.msra.mxu0 %v2138_v62 }
  0x72   :  { %732 = vmatpush1.bf16.msra.mxu1 %v1918_v11  ;;  %1546 = vmatprep.subr.bf16.mxu0 %v2488_v33 }
  0x73   :  { %733 = vmatprep.subr.bf16.mxu1 %v1924_v13 }
  0x75   :  { %1547 = vmatpush3.bf16.msra.mxu0 %v2144_v36 }
  0x76   :  { %734 = vmatpush1.bf16.msra.mxu1 %v1930_v15  ;;  %1548 = vmatprep.subr.bf16.mxu0 %v2488_v33 }
  0x77   :  { %735 = vmatprep.subr.bf16.mxu1 %v1936_v17 }
  0x79   :  { %1549 = vmatpush3.bf16.msra.mxu0 %v2150_v54 }
  0x7a   :  { %736 = vmatpush1.bf16.msra.mxu1 %v1942_v19  ;;  %1550 = vmatprep.subr.bf16.mxu0 %v2488_v33 }
  0x7b   :  { %737 = vmatprep.subr.bf16.mxu1 %v1948_v21 }
  0x7d   :  { %1551 = vmatpush3.bf16.msra.mxu0 %v2156_v46 }
  0x7e   :  { %738 = vmatpush1.bf16.msra.mxu1 %v1954_v23  ;;  %1552 = vmatprep.subr.bf16.mxu0 %v2488_v33 }
  0x7f   :  { %739 = vmatprep.subr.bf16.mxu1 %v1960_v25 }
  0x81   :  { %1553 = vmatpush3.bf16.msra.mxu0 %v2162_v40 }
  0x82   :  { %740 = vmatpush1.bf16.msra.mxu1 %v1966_v27  ;;  %1554 = vmatprep.subr.bf16.mxu0 %v2488_v33  ;;  %v2557_v33 = vmov 0  }
  0x83   :  { %741 = vmatprep.subr.bf16.mxu1 %v1970_v29 }
  0x85   :  { %1555 = vmatpush3.bf16.msra.mxu0 %v2168_v37 }
  0x86   :  { %742 = vmatpush1.bf16.msra.mxu1 %v1986_v34  ;;  %770 = vmatprep.subr.bf16.mxu0 %v1894_v2 }
  0x87   :  { %743 = vmatprep.subr.bf16.mxu1 %v1994_v38 }
  0x88   :  { %1557 = vmatmul.mubr.bf16.vlgmr.msra.gmra.mxu0 %v2004_v43  ;;  %v2558_v43 = vld [vmem:[#allocation19_spill] sm:$0xff] }
  0x89   :  { %771 = vmatpush1.bf16.msra.mxu0 %v1899_v4  ;;  %802 = vmatprep.mubr.bf16.mxu0 %v2557_v33 }
  0x8a   :  { %744 = vmatpush2.bf16.msra.mxu1 %v2002_v42  ;;  %772 = vmatprep.subr.bf16.mxu0 %v1906_v6 }
  0x8b   :  { %745 = vmatprep.subr.bf16.mxu1 %v2010_v45 }
  0x8d   :  { %773 = vmatpush1.bf16.msra.mxu0 %v1911_v8 }
  0x8e   :  { %746 = vmatpush2.bf16.msra.mxu1 %v2017_v47  ;;  %774 = vmatprep.subr.bf16.mxu0 %v1916_v10 }
  0x8f   :  { %747 = vmatprep.subr.bf16.mxu1 %v2025_v49 }
  0x91   :  { %775 = vmatpush1.bf16.msra.mxu0 %v1920_v12 }
  0x92   :  { %748 = vmatpush2.bf16.msra.mxu1 %v2029_v51  ;;  %776 = vmatprep.subr.bf16.mxu0 %v1928_v14 }
  0x93   :  { %749 = vmatprep.subr.bf16.mxu1 %v2035_v53 }
  0x95   :  { %777 = vmatpush1.bf16.msra.mxu0 %v1934_v16 }
  0x96   :  { %750 = vmatpush2.bf16.msra.mxu1 %v2041_v55  ;;  %778 = vmatprep.subr.bf16.mxu0 %v1940_v18 }
  0x97   :  { %751 = vmatprep.subr.bf16.mxu1 %v2047_v57 }
  0x99   :  { %779 = vmatpush1.bf16.msra.mxu0 %v1944_v20 }
  0x9a   :  { %752 = vmatpush2.bf16.msra.mxu1 %v2053_v59  ;;  %780 = vmatprep.subr.bf16.mxu0 %v1952_v22 }
  0x9b   :  { %753 = vmatprep.subr.bf16.mxu1 %v2057_v61  ;;  %v2561_v61 = vld [vmem:[#allocation21_spill] sm:$0xff] }
  0x9d   :  { %781 = vmatpush1.bf16.msra.mxu0 %v1958_v24 }
  0x9e   :  { %754 = vmatpush2.bf16.msra.mxu1 %v2073_v41  ;;  %782 = vmatprep.subr.bf16.mxu0 %v1964_v26  ;;  %v2559_v41 = vmov 0.0  }
  0x9f   :  { %755 = vmatprep.subr.bf16.mxu1 %v2087_v58  ;;  %v2560_v58 = vld [vmem:[#allocation16_spill] sm:$0xff] }
  0xa1   :  { %783 = vmatpush1.bf16.msra.mxu0 %v1968_v28 }
  0xa2   :  { %756 = vmatpush2.bf16.msra.mxu1 %v2095_v50  ;;  %784 = vmatprep.subr.bf16.mxu0 %v1980_v32  ;;  %v2562_v50 = vld [vmem:[#allocation23_spill] sm:$0xff] }
  0xa3   :  { %757 = vmatprep.subr.bf16.mxu1 %v2105_v39  ;;  %v2564_v39 = vld [vmem:[#allocation27_spill] sm:$0xff] }
  0xa5   :  { %785 = vmatpush1.bf16.msra.mxu0 %v1988_v35 }
  0xa6   :  { %758 = vmatpush2.bf16.msra.mxu1 %v2115_v63  ;;  %1447 = vmatprep.subr.bf16.mxu0 %v2558_v43  ;;  %v2563_v63 = vld [vmem:[#allocation25_spill] sm:$0xff] }
  0xa7   :  { %1560 = vmatprep.subr.bf16.mxu1 %v2559_v41 }
  0xa8   :  { %803 = vmatmul.mubr.bf16.vlgmr.msra.gmra.mxu0 %v2560_v58 }
  0xa9   :  { %760 = vmatmul.mubr.bf16.vlgmr.msra.gmra.mxu1 %v2083_v30  ;;  %1448 = vmatpush3.bf16.msra.mxu0 %v2561_v61  ;;  %v2565_v61 = vld [vmem:[#allocation29_spill] sm:$0xff] }
  0xaa   :  { %1561 = vmatpush3.bf16.msra.mxu1 %v2123_v48  ;;  %1449 = vmatprep.subr.bf16.mxu0 %v2562_v50  ;;  %v2566_v50 = vld [vmem:[#allocation31_spill] sm:$0xff] }
  0xab   :  { %1562 = vmatprep.subr.bf16.mxu1 %v2559_v41  ;;  %845 = vmatprep.mubr.bf16.mxu0 %v2077_v0  ;;  %v2567_v0 = vld [vmem:[#allocation33_spill] sm:$0xff]  ;;  %v2568_v48 = vld [vmem:[#allocation35_spill] sm:$0xff] }
  0xac   :  { %1576 = vmatprep.mubr.msk.bf16.mxu1 %vm1857_vm0, %v2559_v41 }
  0xad   :  { %1450 = vmatpush3.bf16.msra.mxu0 %v2563_v63  ;;  %v2569_v63 = vld [vmem:[#allocation37_spill] sm:$0xff] }
  0xae   :  { %1563 = vmatpush3.bf16.msra.mxu1 %v2129_v60  ;;  %1451 = vmatprep.subr.bf16.mxu0 %v2564_v39  ;;  %v2570_v39 = vld [vmem:[#allocation39_spill] sm:$0xff] }
  0xaf   :  { %1564 = vmatprep.subr.bf16.mxu1 %v2559_v41 }
  0xb1   :  { %1452 = vmatpush3.bf16.msra.mxu0 %v2565_v61  ;;  %v2571_v61 = vld [vmem:[#allocation45_spill] sm:$0xff] }
  0xb2   :  { %1565 = vmatpush3.bf16.msra.mxu1 %v2138_v62  ;;  %1453 = vmatprep.subr.bf16.mxu0 %v2566_v50 }
  0xb3   :  { %1566 = vmatprep.subr.bf16.mxu1 %v2559_v41 }
  0xb5   :  { %1454 = vmatpush3.bf16.msra.mxu0 %v2567_v0 }
  0xb6   :  { %1567 = vmatpush3.bf16.msra.mxu1 %v2144_v36  ;;  %1455 = vmatprep.subr.bf16.mxu0 %v2568_v48 }
  0xb7   :  { %1568 = vmatprep.subr.bf16.mxu1 %v2559_v41 }
  0xb9   :  { %1456 = vmatpush3.bf16.msra.mxu0 %v2569_v63 }
  0xba   :  { %1569 = vmatpush3.bf16.msra.mxu1 %v2150_v54  ;;  %1457 = vmatprep.subr.bf16.mxu0 %v2570_v39 }
  0xbb   :  { %1570 = vmatprep.subr.bf16.mxu1 %v2559_v41 }
  0xbd   :  { %1458 = vmatpush3.bf16.msra.mxu0 %v2571_v61 }
  0xbe   :  { %1571 = vmatpush3.bf16.msra.mxu1 %v2156_v46  ;;  %1459 = vmatprep.subr.bf16.mxu0 %v2093_v52 }
  0xbf   :  { %1572 = vmatprep.subr.bf16.mxu1 %v2559_v41 }
  0xc1   :  { %1460 = vmatpush3.bf16.msra.mxu0 %v2099_v44 }
  0xc2   :  { %1573 = vmatpush3.bf16.msra.mxu1 %v2162_v40  ;;  %1461 = vmatprep.subr.bf16.mxu0 %v2109_v56 }
  0xc3   :  { %1574 = vmatprep.subr.bf16.mxu1 %v2559_v41 }
  0xc5   :  { %1462 = vmatpush3.bf16.msra.mxu0 %v2117_v31 }
  0xc6   :  { %1575 = vmatpush3.bf16.msra.mxu1 %v2168_v37  ;;  %931 = vmatprep.subr.bf16.mxu0 %v1892_v1  ;;  %v2572_v1 = vld [vmem:[#allocation38_spill] sm:$0xff] }
  0xc7   :  { %974 = vmatprep.subr.bf16.mxu1 %v1894_v2  ;;  %v2573_v2 = vld [vmem:[#allocation44_spill] sm:$0xff] }
  0xc8   :  { %846 = vmatmul.mubr.bf16.vlgmr.msra.gmra.mxu0 %v2083_v30 }
  0xc9   :  { %1577 = vmatmul.mubr.bf16.vlgmr.msra.gmra.mxu1 %v2560_v58  ;;  %932 = vmatpush1.bf16.msra.mxu0 %v1897_v3  ;;  %v2574_v3 = vld [vmem:[#allocation46_spill] sm:$0xff] }
  0xca   :  { %975 = vmatpush1.bf16.msra.mxu1 %v1899_v4  ;;  %933 = vmatprep.subr.bf16.mxu0 %v1902_v5  ;;  %v2575_v4 = vld [vmem:[#allocation47_spill] sm:$0xff]  ;;  %v2576_v5 = vld [vmem:[#allocation48_spill] sm:$0xff] }
  0xcb   :  { %976 = vmatprep.subr.bf16.mxu1 %v1906_v6  ;;  %1006 = vmatprep.mubr.bf16.mxu1 %v2557_v33  ;;  %v2577_v6 = vld [vmem:[#allocation49_spill] sm:$0xff] }
  0xcd   :  { %934 = vmatpush1.bf16.msra.mxu0 %v1908_v7 }
  0xce   :  { %977 = vmatpush1.bf16.msra.mxu1 %v1911_v8  ;;  %935 = vmatprep.subr.bf16.mxu0 %v1914_v9 }
  0xcf   :  { %978 = vmatprep.subr.bf16.mxu1 %v1916_v10 }
  0xd1   :  { %936 = vmatpush1.bf16.msra.mxu0 %v1918_v11 }
  0xd2   :  { %979 = vmatpush1.bf16.msra.mxu1 %v1920_v12  ;;  %937 = vmatprep.subr.bf16.mxu0 %v1924_v13 }
  0xd3   :  { %980 = vmatprep.subr.bf16.mxu1 %v1928_v14 }
  0xd5   :  { %938 = vmatpush1.bf16.msra.mxu0 %v1930_v15 }
  0xd6   :  { %981 = vmatpush1.bf16.msra.mxu1 %v1934_v16  ;;  %939 = vmatprep.subr.bf16.mxu0 %v1936_v17 }
  0xd7   :  { %982 = vmatprep.subr.bf16.mxu1 %v1940_v18 }
  0xd9   :  { %940 = vmatpush1.bf16.msra.mxu0 %v1942_v19 }
  0xda   :  { %983 = vmatpush1.bf16.msra.mxu1 %v1944_v20  ;;  %941 = vmatprep.subr.bf16.mxu0 %v1948_v21 }
  0xdb   :  { %984 = vmatprep.subr.bf16.mxu1 %v1952_v22 }
  0xdd   :  { %942 = vmatpush1.bf16.msra.mxu0 %v1954_v23 }
  0xde   :  { %985 = vmatpush1.bf16.msra.mxu1 %v1958_v24  ;;  %943 = vmatprep.subr.bf16.mxu0 %v1960_v25 }
  0xdf   :  { %986 = vmatprep.subr.bf16.mxu1 %v1964_v26 }
  0xe1   :  { %944 = vmatpush1.bf16.msra.mxu0 %v1966_v27 }
  0xe2   :  { %987 = vmatpush1.bf16.msra.mxu1 %v1968_v28  ;;  %945 = vmatprep.subr.bf16.mxu0 %v1970_v29 }
  0xe3   :  { %988 = vmatprep.subr.bf16.mxu1 %v1980_v32 }
  0xe5   :  { %946 = vmatpush1.bf16.msra.mxu0 %v1986_v34 }
  0xe6   :  { %989 = vmatpush1.bf16.msra.mxu1 %v1988_v35  ;;  %947 = vmatprep.subr.bf16.mxu0 %v1994_v38 }
  0xe7   :  { %1478 = vmatprep.subr.bf16.mxu1 %v2558_v43 }
  0xe9   :  { %948 = vmatpush2.bf16.msra.mxu0 %v2002_v42 }
  0xea   :  { %949 = vmatprep.subr.bf16.mxu0 %v2010_v45 }
  0xed   :  { %950 = vmatpush2.bf16.msra.mxu0 %v2017_v47 }
  0xee   :  { %951 = vmatprep.subr.bf16.mxu0 %v2025_v49 }
  0xf1   :  { %952 = vmatpush2.bf16.msra.mxu0 %v2029_v51 }
  0xf2   :  { %953 = vmatprep.subr.bf16.mxu0 %v2035_v53 }
  0xf5   :  { %954 = vmatpush2.bf16.msra.mxu0 %v2041_v55 }
  0xf6   :  { %955 = vmatprep.subr.bf16.mxu0 %v2047_v57 }
  0xf9   :  { %956 = vmatpush2.bf16.msra.mxu0 %v2053_v59 }
  0xfa   :  { %957 = vmatprep.subr.bf16.mxu0 %v2572_v1 }
  0xfd   :  { %958 = vmatpush2.bf16.msra.mxu0 %v2573_v2 }
  0xfe   :  { %959 = vmatprep.subr.bf16.mxu0 %v2574_v3 }
 0x101   :  { %960 = vmatpush2.bf16.msra.mxu0 %v2575_v4 }
 0x102   :  { %961 = vmatprep.subr.bf16.mxu0 %v2576_v5 }
 0x105   :  { %962 = vmatpush2.bf16.msra.mxu0 %v2577_v6 }
 0x106   :  { %1580 = vmatprep.subr.bf16.mxu0 %v2559_v41 }
 0x109   :  { %v636_v13 = vpop.f32.mrf.mxu1 }
 0x10b   :  { %v638_v19 = vpop.f32.mrf.mxu1 }
 0x10d   :  { %v640_v21 = vpop.f32.mrf.mxu1 }
 0x10f   :  { %v642_v23 = vpop.f32.mrf.mxu1 }
 0x128   :  { %v593_v7 = vpop.f32.mrf.mxu0 }
 0x129   :  { %v1432_v25 = vpop.f32.mrf.mxu1  ;;  %v637_v5 = vadd.f32 %v636_v13, %v593_v7  ;;  %v2578_v13 = vld [vmem:[#allocation42_spill] sm:$0xff] }
 0x12a   :  { %v595_v8 = vpop.f32.mrf.mxu0 }
 0x12b   :  { %v1433_v30 = vpop.f32.mrf.mxu1  ;;  %v639_v2 = vadd.f32 %v638_v19, %v595_v8 }
 0x12c   :  { %v597_v9 = vpop.f32.mrf.mxu0 }
 0x12d   :  { %v2302_v58 = vpop.f32.mrf.mxu1  ;;  %v641_v57 = vadd.f32 %v640_v21, %v597_v9  ;;  %v2580_v9 = vld [vmem:[#allocation43_spill] sm:$0xff] }
 0x12e   :  { %v599_v10 = vpop.f32.mrf.mxu0 }
 0x12f   :  { %v2304_v6 = vpop.f32.mrf.mxu1  ;;  %v643_v49 = vadd.f32 %v642_v23, %v599_v10  ;;  %v2581_v10 = vld [vmem:[#allocation41_spill] sm:$0xff] }
 0x148   :  { %v2298_v11 = vpop.f32.mrf.mxu0 }
 0x14a   :  { %v1558_v12 = vpop.f32.mrf.mxu0 }
 0x14c   :  { %v2300_v15 = vpop.f32.mrf.mxu0 }
 0x14e   :  { %v1559_v17 = vpop.f32.mrf.mxu0 }
 0x168   :  { %v804_v3 = vpop.f32.mrf.mxu0 }
 0x169   :  { %v761_v4 = vpop.f32.mrf.mxu1 }
 0x16a   :  { %v762_v1 = vadd.f32 %v761_v4, %v637_v5  ;;  %v806_v12 = vpop.f32.mrf.mxu0  ;;  %v2579_v5 = vld [vmem:[#allocation40_spill] sm:$0xff] }
 0x16b   :  { %v763_v59 = vpop.f32.mrf.mxu1 }
 0x16c   :  { %v805_v55 = vadd.f32 %v804_v3, %v762_v1  ;;  %v764_v53 = vadd.f32 %v763_v59, %v639_v2  ;;  %v808_v51 = vpop.f32.mrf.mxu0 }
 0x16d   :  { %v765_v17 = vpop.f32.mrf.mxu1 }
 0x16e   :  { %v895_v47 = vmul.f32 0.020833334, %v805_v55  ;;  %v807_v45 = vadd.f32 %v806_v12, %v764_v53  ;;  %v766_v42 = vadd.f32 %v765_v17, %v641_v57  ;;  %v810_v7 = vpop.f32.mrf.mxu0  ;;  %v2582_v12 = vld [vmem:[#allocation50_spill] sm:$0xff] }
 0x16f   :  { %v767_v38 = vpop.f32.mrf.mxu1 }
 0x170   :  { %v896_v34 = vmul.f32 0.020833334, %v807_v45  ;;  %v809_v29 = vadd.f32 %v808_v51, %v766_v42  ;;  %v768_v27 = vadd.f32 %v767_v38, %v643_v49  ;;  %v901_v43 = vsub.f32 %v2578_v13, %v895_v47 }
 0x172   :  { %v898_v8 = vmul.f32 0.020833334, %v809_v29  ;;  %v811_v4 = vadd.f32 %v810_v7, %v768_v27  ;;  %v902_v19 = vsub.f32 %v2579_v5, %v896_v34  ;;  %v907_v2 = vmul.f32 %v901_v43, %v901_v43 }
 0x174   :  { %v904_v1 = vsub.f32 %v2580_v9, %v898_v8  ;;  %v899_v59 = vmul.f32 0.020833334, %v811_v4  ;;  %v908_v53 = vmul.f32 %v902_v19, %v902_v19  ;;  %v1434_v8 = vadd.f32 %v1433_v30, %v1432_v25 }
 0x176   :  { %v910_v3 = vmul.f32 %v904_v1, %v904_v1  ;;  %v905_v55 = vsub.f32 %v2581_v10, %v899_v59  ;;  %v721_v9 = vadd.f32 %v1434_v8, %v2298_v11 }
 0x178   :  { %v2310_v57 = vpack.c.bf16 %v910_v3, %v907_v2  ;;  %v911_v45 = vmul.f32 %v905_v55, %v905_v55 }
 0x17a   :  { %v919_v38 = vunpack.c.h.bf16 %v2310_v57  ;;  %v2313_v42 = vpack.c.bf16 %v911_v45, %v908_v53  ;;  %v916_v29 = vunpack.c.l.bf16 %v2310_v57 }
 0x17c   :  { %v920_v27 = vunpack.c.h.bf16 %v2313_v42  ;;  %v917_v34 = vunpack.c.l.bf16 %v2313_v42  ;;  %v925_v47 = vsub.f32 %v910_v3, %v919_v38  ;;  %v922_v49 = vsub.f32 %v907_v2, %v916_v29 }
 0x17d   :  { %v1437_v3 = vadd.f32 %v2304_v6, %v2302_v58 }
 0x17e   :  { %v926_v51 = vsub.f32 %v911_v45, %v920_v27  ;;  %v923_v43 = vsub.f32 %v908_v53, %v917_v34  ;;  %v2318_v23 = vpack.c.bf16 %v925_v47, %v922_v49  ;;  %v2583_v27 = vld [vmem:[#allocation14_spill] sm:$0xff]  ;;  %v2584_v34 = vld [vmem:[#allocation15_spill] sm:$0xff] }
 0x17f   :  { %v724_v45 = vadd.f32 %v1437_v3, %v2300_v15  ;;  %v2587_v3 = vld [vmem:[#allocation25_spill] sm:$0xff] }
 0x180   :  { %v929_v21 = vpack.c.bf16 %v926_v51, %v923_v43 }
 0x182   :  { %963 = vmatprep.mubr.bf16.mxu0 %v929_v21 }
 0x183   :  { %964 = vmatmul.mubr.bf16.vlgmr.msra.gmra.mxu0 %v2318_v23 }
 0x184   :  { %1581 = vmatpush3.bf16.msra.mxu0 %v2582_v12  ;;  %1596 = vmatprep.mubr.msk.bf16.mxu0 %vm1857_vm0, %v2559_v41 }
 0x185   :  { %1582 = vmatprep.subr.bf16.mxu0 %v2559_v41 }
 0x188   :  { %1583 = vmatpush3.bf16.msra.mxu0 %v2129_v60  ;;  %v1463_v17 = vpop.f32.mrf.mxu0 }
 0x189   :  { %v888_v7 = vpop.f32.mrf.mxu1  ;;  %1584 = vmatprep.subr.bf16.mxu0 %v2559_v41 }
 0x18a   :  { %v1464_v4 = vpop.f32.mrf.mxu0 }
 0x18b   :  { %v1578_v19 = vpop.f32.mrf.mxu1  ;;  %v1465_v1 = vadd.f32 %v1464_v4, %v1463_v17  ;;  %v1739_v4 = vld [vmem:[#allocation7 + $0x22c] ss:$12 sps:$4 sm:$0xff]  }
 0x18c   :  { %1585 = vmatpush3.bf16.msra.mxu0 %v2138_v62  ;;  %v1466_v59 = vpop.f32.mrf.mxu0 }
 0x18d   :  { %v891_v2 = vpop.f32.mrf.mxu1  ;;  %1586 = vmatprep.subr.bf16.mxu0 %v2559_v41  ;;  %v848_v10 = vadd.f32 %v1465_v1, %v721_v9  ;;  %v2585_v9 = vld [vmem:[#allocation21_spill] sm:$0xff]  ;;  %v1740_v1 = vld [vmem:[#allocation7 + $0x228] ss:$12 sps:$4 sm:$0xff]  }
 0x18e   :  { %v1467_v55 = vpop.f32.mrf.mxu0 }
 0x18f   :  { %v1579_v53 = vpop.f32.mrf.mxu1  ;;  %v889_v25 = vadd.f32 %v888_v7, %v848_v10  ;;  %v1468_v30 = vadd.f32 %v1467_v55, %v1466_v59  ;;  %v2586_v59 = vld [vmem:[#allocation23_spill] sm:$0xff]  ;;  %v1742_v10 = vld [vmem:[#allocation7 + $0x210] ss:$12 sps:$4 sm:$0xff]  }
 0x190   :  { %1587 = vmatpush3.bf16.msra.mxu0 %v2144_v36  ;;  %v2588_v55 = vld [vmem:[#allocation27_spill] sm:$0xff] }
 0x191   :  { %1588 = vmatprep.subr.bf16.mxu0 %v2559_v41  ;;  %v897_v11 = vmul.f32 0.020833334, %v889_v25  ;;  %v851_v38 = vadd.f32 %v1468_v30, %v724_v45  ;;  %v1743_v53 = vld [vmem:[#allocation7 + $0x1fc] ss:$12 sps:$4 sm:$0xff]   ;;  %v1744_v25 = vld [vmem:[#allocation7 + $0x1f8] ss:$12 sps:$4 sm:$0xff]  }
 0x192   :  { %v2589_v45 = vld [vmem:[#allocation29_spill] sm:$0xff]  ;;  %v2598_v30 = vld [vmem:[#allocation26_spill] sm:$0xff] }
 0x193   :  { %v892_v29 = vadd.f32 %v891_v2, %v851_v38  ;;  %v903_v6 = vsub.f32 %v2583_v27, %v897_v11  ;;  %v1741_v2 = vld [vmem:[#allocation7 + $0x214] ss:$12 sps:$4 sm:$0xff]  }
 0x194   :  { %1589 = vmatpush3.bf16.msra.mxu0 %v2150_v54  ;;  %v2600_v11 = vld [vmem:[#allocation30_spill] sm:$0xff]  ;;  %v2605_v27 = vld [vmem:[#allocation44_spill] sm:$0xff] }
 0x195   :  { %1590 = vmatprep.subr.bf16.mxu0 %v2559_v41  ;;  %v900_v58 = vmul.f32 0.020833334, %v892_v29  ;;  %v909_v15 = vmul.f32 %v903_v6, %v903_v6  ;;  %v2602_v38 = vld [vmem:[#allocation34_spill] sm:$0xff] }
 0x196   :  { %v2604_v29 = vld [vmem:[#allocation38_spill] sm:$0xff] }
 0x197   :  { %v906_v47 = vsub.f32 %v2584_v34, %v900_v58  ;;  %v2606_v6 = vld [vmem:[#allocation46_spill] sm:$0xff]  ;;  %v2607_v58 = vld [vmem:[#allocation47_spill] sm:$0xff]  ;;  %v2608_v34 = vld [vmem:[#allocation48_spill] sm:$0xff] }
 0x198   :  { %1591 = vmatpush3.bf16.msra.mxu0 %v2156_v46 }
 0x199   :  { %1592 = vmatprep.subr.bf16.mxu0 %v2559_v41  ;;  %v912_v49 = vmul.f32 %v906_v47, %v906_v47  ;;  %v2609_v47 = vld [vmem:[#allocation49_spill] sm:$0xff] }
 0x19b   :  { %v2341_v51 = vpack.c.bf16 %v912_v49, %v909_v15 }
 0x19c   :  { %1593 = vmatpush3.bf16.msra.mxu0 %v2162_v40 }
 0x19d   :  { %1594 = vmatprep.subr.bf16.mxu0 %v2559_v41  ;;  %v918_v43 = vunpack.c.l.bf16 %v2341_v51  ;;  %v921_v17 = vunpack.c.h.bf16 %v2341_v51 }
 0x19f   :  { %v924_v7 = vsub.f32 %v909_v15, %v918_v43  ;;  %v927_v8 = vsub.f32 %v912_v49, %v921_v17 }
 0x1a0   :  { %1595 = vmatpush3.bf16.msra.mxu0 %v2168_v37 }
 0x1a1   :  { %1142 = vmatprep.subr.bf16.mxu0 %v1739_v4  ;;  %v930_v19 = vpack.c.bf16 %v927_v8, %v924_v7 }
 0x1a3   :  { %1007 = vmatmul.mubr.bf16.vlgmr.msra.gmra.mxu1 %v930_v19  ;;  %1597 = vmatmul.mubr.bf16.vlgmr.msra.gmra.mxu0 %v930_v19 }
 0x1a4   :  { %1479 = vmatpush3.bf16.msra.mxu1 %v2585_v9  ;;  %1143 = vmatpush1.bf16.msra.mxu0 %v1740_v1 }
 0x1a5   :  { %1049 = vmatprep.mubr.bf16.mxu1 %v929_v21  ;;  %1480 = vmatprep.subr.bf16.mxu1 %v2586_v59  ;;  %v1756_v21 = vld [vmem:[#allocation7 + $0x30] ss:$12 sps:$4 sm:$0xff]  }
 0x1a6   :  { %1144 = vmatprep.subr.bf16.mxu0 %v1741_v2  ;;  %1174 = vmatprep.mubr.bf16.mxu0 %v2557_v33  ;;  %v1754_v33 = vld [vmem:[#allocation7 + $0x48] ss:$12 sps:$4 sm:$0xff]  }
 0x1a8   :  { %1481 = vmatpush3.bf16.msra.mxu1 %v2587_v3  ;;  %1145 = vmatpush1.bf16.msra.mxu0 %v1742_v10 }
 0x1a9   :  { %1482 = vmatprep.subr.bf16.mxu1 %v2588_v55  ;;  %1146 = vmatprep.subr.bf16.mxu0 %v1743_v53 }
 0x1ac   :  { %1483 = vmatpush3.bf16.msra.mxu1 %v2589_v45  ;;  %1147 = vmatpush1.bf16.msra.mxu0 %v1744_v25 }
 0x1ad   :  { %1484 = vmatprep.subr.bf16.mxu1 %v2566_v50  ;;  %1148 = vmatprep.subr.bf16.mxu0 %v1928_v14  ;;  %v1745_v14 = vld [vmem:[#allocation7 + $0xac] ss:$12 sps:$4 sm:$0xff]  }
 0x1b0   :  { %1485 = vmatpush3.bf16.msra.mxu1 %v2567_v0  ;;  %1149 = vmatpush1.bf16.msra.mxu0 %v1934_v16  ;;  %v2590_v16 = vld [vmem:[#allocation19_spill] sm:$0xff] }
 0x1b1   :  { %1486 = vmatprep.subr.bf16.mxu1 %v2568_v48  ;;  %1150 = vmatprep.subr.bf16.mxu0 %v1940_v18  ;;  %v1746_v18 = vld [vmem:[#allocation7 + $0xa8] ss:$12 sps:$4 sm:$0xff]  }
 0x1b4   :  { %1487 = vmatpush3.bf16.msra.mxu1 %v2569_v63  ;;  %1151 = vmatpush1.bf16.msra.mxu0 %v1944_v20  ;;  %v1747_v20 = vld [vmem:[#allocation7 + $0x94] ss:$12 sps:$4 sm:$0xff]  }
 0x1b5   :  { %1488 = vmatprep.subr.bf16.mxu1 %v2570_v39  ;;  %1152 = vmatprep.subr.bf16.mxu0 %v1952_v22  ;;  %v1748_v22 = vld [vmem:[#allocation7 + $0x90] ss:$12 sps:$4 sm:$0xff]  }
 0x1b8   :  { %1489 = vmatpush3.bf16.msra.mxu1 %v2571_v61  ;;  %1153 = vmatpush1.bf16.msra.mxu0 %v1958_v24  ;;  %v1749_v24 = vld [vmem:[#allocation7 + $0x7c] ss:$12 sps:$4 sm:$0xff]  }
 0x1b9   :  { %1490 = vmatprep.subr.bf16.mxu1 %v2093_v52  ;;  %1154 = vmatprep.subr.bf16.mxu0 %v1964_v26  ;;  %v1750_v26 = vld [vmem:[#allocation7 + $0x78] ss:$12 sps:$4 sm:$0xff]  }
 0x1bc   :  { %1491 = vmatpush3.bf16.msra.mxu1 %v2099_v44  ;;  %1155 = vmatpush1.bf16.msra.mxu0 %v1968_v28  ;;  %v1751_v28 = vld [vmem:[#allocation7 + $0x64] ss:$12 sps:$4 sm:$0xff]  }
 0x1bd   :  { %1492 = vmatprep.subr.bf16.mxu1 %v2109_v56  ;;  %1156 = vmatprep.subr.bf16.mxu0 %v1980_v32  ;;  %v1752_v32 = vld [vmem:[#allocation7 + $0x60] ss:$12 sps:$4 sm:$0xff]  }
 0x1c0   :  { %1493 = vmatpush3.bf16.msra.mxu1 %v2117_v31  ;;  %1157 = vmatpush1.bf16.msra.mxu0 %v1988_v35  ;;  %v1753_v35 = vld [vmem:[#allocation7 + $0x4c] ss:$12 sps:$4 sm:$0xff]  }
 0x1c1   :  { %1099 = vmatprep.subr.bf16.mxu1 %v1745_v14  ;;  %1509 = vmatprep.subr.bf16.mxu0 %v2590_v16 }
 0x1c3   :  { %1050 = vmatmul.mubr.bf16.vlgmr.msra.gmra.mxu1 %v2318_v23  ;;  %1175 = vmatmul.mubr.bf16.vlgmr.msra.gmra.mxu0 %v2341_v51  ;;  %v2596_v23 = vld [vmem:[#allocation22_spill] sm:$0xff] }
 0x1c4   :  { %1100 = vmatpush1.bf16.msra.mxu1 %v1746_v18  ;;  %1131 = vmatprep.mubr.bf16.mxu1 %v2313_v42 }
 0x1c5   :  { %1510 = vmatpush3.bf16.msra.mxu0 %v2585_v9  ;;  %1217 = vmatprep.mubr.bf16.mxu0 %v2313_v42  ;;  %v1755_v42 = vld [vmem:[#allocation7 + $0x34] ss:$12 sps:$4 sm:$0xff]  }
 0x1c6   :  { %1101 = vmatprep.subr.bf16.mxu1 %v1747_v20  ;;  %1511 = vmatprep.subr.bf16.mxu0 %v2586_v59 }
 0x1c8   :  { %1102 = vmatpush1.bf16.msra.mxu1 %v1748_v22 }
 0x1c9   :  { %1512 = vmatpush3.bf16.msra.mxu0 %v2587_v3  ;;  %1103 = vmatprep.subr.bf16.mxu1 %v1749_v24 }
 0x1ca   :  { %1513 = vmatprep.subr.bf16.mxu0 %v2588_v55 }
 0x1cc   :  { %1104 = vmatpush1.bf16.msra.mxu1 %v1750_v26 }
 0x1cd   :  { %1514 = vmatpush3.bf16.msra.mxu0 %v2589_v45  ;;  %1105 = vmatprep.subr.bf16.mxu1 %v1751_v28 }
 0x1ce   :  { %1515 = vmatprep.subr.bf16.mxu0 %v2566_v50  ;;  %v1757_v50 = vld [vmem:[#allocation7 + $0x1c] ss:$12 sps:$4 sm:$0xff]  }
 0x1d0   :  { %1106 = vmatpush1.bf16.msra.mxu1 %v1752_v32 }
 0x1d1   :  { %1516 = vmatpush3.bf16.msra.mxu0 %v2567_v0  ;;  %1107 = vmatprep.subr.bf16.mxu1 %v1753_v35  ;;  %v2591_v0 = vld [vmem:[#allocation12_spill] sm:$0xff] }
 0x1d2   :  { %1517 = vmatprep.subr.bf16.mxu0 %v2568_v48  ;;  %v2592_v48 = vld [vmem:[#allocation13_spill] sm:$0xff] }
 0x1d4   :  { %1108 = vmatpush1.bf16.msra.mxu1 %v1754_v33 }
 0x1d5   :  { %1518 = vmatpush3.bf16.msra.mxu0 %v2569_v63  ;;  %1109 = vmatprep.subr.bf16.mxu1 %v1755_v42  ;;  %v2593_v63 = vld [vmem:[#allocation17_spill] sm:$0xff] }
 0x1d6   :  { %1519 = vmatprep.subr.bf16.mxu0 %v2570_v39  ;;  %v2594_v39 = vld [vmem:[#allocation18_spill] sm:$0xff] }
 0x1d8   :  { %1110 = vmatpush1.bf16.msra.mxu1 %v1756_v21 }
 0x1d9   :  { %1520 = vmatpush3.bf16.msra.mxu0 %v2571_v61  ;;  %1111 = vmatprep.subr.bf16.mxu1 %v1757_v50  ;;  %v2595_v61 = vld [vmem:[#allocation20_spill] sm:$0xff]  ;;  %v1299_v50 = vlaneseq }
 0x1da   :  { %1521 = vmatprep.subr.bf16.mxu0 %v2093_v52  ;;  %v2597_v52 = vld [vmem:[#allocation24_spill] sm:$0xff] }
 0x1dc   :  { %1112 = vmatpush1.bf16.msra.mxu1 %v2591_v0 }
 0x1dd   :  { %1522 = vmatpush3.bf16.msra.mxu0 %v2099_v44  ;;  %1113 = vmatprep.subr.bf16.mxu1 %v2592_v48  ;;  %v2599_v44 = vld [vmem:[#allocation28_spill] sm:$0xff] }
 0x1de   :  { %1523 = vmatprep.subr.bf16.mxu0 %v2109_v56  ;;  %v2601_v56 = vld [vmem:[#allocation32_spill] sm:$0xff] }
 0x1e0   :  { %1114 = vmatpush1.bf16.msra.mxu1 %v2593_v63 }
 0x1e1   :  { %1524 = vmatpush3.bf16.msra.mxu0 %v2117_v31  ;;  %1115 = vmatprep.subr.bf16.mxu1 %v2594_v39  ;;  %v2603_v31 = vld [vmem:[#allocation36_spill] sm:$0xff] }
 0x1e4   :  { %1218 = vmatmul.mubr.bf16.vlgmr.msra.gmra.mxu0 %v2310_v57  ;;  %1116 = vmatpush2.bf16.msra.mxu1 %v2595_v61 }
 0x1e5   :  { %1117 = vmatprep.subr.bf16.mxu1 %v2596_v23 }
 0x1e8   :  { %1118 = vmatpush2.bf16.msra.mxu1 %v2597_v52  ;;  %v1300_v52 = vshrl.u32 %v1299_v50, 7 }
 0x1e9   :  { %1119 = vmatprep.subr.bf16.mxu1 %v2598_v30 }
 0x1ec   :  { %1120 = vmatpush2.bf16.msra.mxu1 %v2599_v44  ;;  %v1301_v44 = vsub.s32 0, %v1300_v52 }
 0x1ed   :  { %1121 = vmatprep.subr.bf16.mxu1 %v2600_v11 }
 0x1f0   :  { %1122 = vmatpush2.bf16.msra.mxu1 %v2601_v56  ;;  %v1291_v56 = vld [vmem:[#allocation5] sm:$0x7] }
 0x1f1   :  { %1123 = vmatprep.subr.bf16.mxu1 %v2602_v38  ;;  %v1305_v38 = vsub.s32 1, %v1300_v52 }
 0x1f4   :  { %1124 = vmatpush2.bf16.msra.mxu1 %v2603_v31  ;;  %v1302_v31 = vrot.slane %v1291_v56, %v1301_v44 }
 0x1f5   :  { %1125 = vmatprep.subr.bf16.mxu1 %v2604_v29 }
 0x1f8   :  { %1126 = vmatpush2.bf16.msra.mxu1 %v2605_v27 }
 0x1f9   :  { %1127 = vmatprep.subr.bf16.mxu1 %v2606_v6 }
 0x1fc   :  { %1128 = vmatpush2.bf16.msra.mxu1 %v2607_v58 }
 0x1fd   :  { %1129 = vmatprep.subr.bf16.mxu1 %v2608_v34  ;;  %v1306_v34 = vrot.slane %v1291_v56, %v1305_v38 }
 0x200   :  { %1130 = vmatpush2.bf16.msra.mxu1 %v2609_v47 }
 0x201   :  { %1600 = vmatprep.subr.bf16.mxu1 %v2559_v41 }
 0x203   :  { %1132 = vmatmul.mubr.bf16.vlgmr.msra.gmra.mxu1 %v2310_v57 }
 0x204   :  { %1601 = vmatpush3.bf16.msra.mxu1 %v2582_v12  ;;  %1616 = vmatprep.mubr.msk.bf16.mxu1 %vm1857_vm0, %v2559_v41 }
 0x205   :  { %1602 = vmatprep.subr.bf16.mxu1 %v2559_v41 }
 0x208   :  { %1603 = vmatpush3.bf16.msra.mxu1 %v2129_v60 }
 0x209   :  { %1604 = vmatprep.subr.bf16.mxu1 %v2559_v41 }
 0x20c   :  { %1605 = vmatpush3.bf16.msra.mxu1 %v2138_v62 }
 0x20d   :  { %1606 = vmatprep.subr.bf16.mxu1 %v2559_v41 }
 0x210   :  { %1607 = vmatpush3.bf16.msra.mxu1 %v2144_v36 }
 0x211   :  { %1608 = vmatprep.subr.bf16.mxu1 %v2559_v41 }
 0x214   :  { %1609 = vmatpush3.bf16.msra.mxu1 %v2150_v54 }
 0x215   :  { %1610 = vmatprep.subr.bf16.mxu1 %v2559_v41 }
 0x218   :  { %1611 = vmatpush3.bf16.msra.mxu1 %v2156_v46 }
 0x219   :  { %1612 = vmatprep.subr.bf16.mxu1 %v2559_v41 }
 0x21c   :  { %1613 = vmatpush3.bf16.msra.mxu1 %v2162_v40 }
 0x21d   :  { %1614 = vmatprep.subr.bf16.mxu1 %v2559_v41 }
 0x220   :  { %1615 = vmatpush3.bf16.msra.mxu1 %v2168_v37 }
 0x223   :  { %1617 = vmatmul.mubr.bf16.vlgmr.msra.gmra.mxu1 %v2341_v51 }
 0x243   :  { %v965_v60 = vpop.f32.mrf.mxu0 }
 0x245   :  { %v967_v62 = vpop.f32.mrf.mxu0 }
 0x247   :  { %v969_v36 = vpop.f32.mrf.mxu0 }
 0x249   :  { %v971_v57 = vpop.f32.mrf.mxu0 }
 0x263   :  { %v2434_v12 = vpop.f32.mrf.mxu0  ;;  %v1008_v49 = vpop.f32.mrf.mxu1 }
 0x264   :  { %v1009_v51 = vadd.f32 %v1008_v49, %v965_v60 }
 0x265   :  { %v1598_v54 = vpop.f32.mrf.mxu0  ;;  %v1010_v43 = vpop.f32.mrf.mxu1 }
 0x266   :  { %v1011_v1 = vadd.f32 %v1010_v43, %v967_v62  ;;  %v1758_v43 = vld [vmem:[#allocation2 + $0x18] sm:$0xff] }
 0x267   :  { %v2436_v15 = vpop.f32.mrf.mxu0  ;;  %v1012_v17 = vpop.f32.mrf.mxu1 }
 0x268   :  { %v1013_v3 = vadd.f32 %v1012_v17, %v969_v36 }
 0x269   :  { %v1599_v46 = vpop.f32.mrf.mxu0  ;;  %v1014_v40 = vpop.f32.mrf.mxu1 }
 0x26a   :  { %v1015_v25 = vadd.f32 %v1014_v40, %v971_v57 }
 0x283   :  { %v1494_v7 = vpop.f32.mrf.mxu1  ;;  %v1176_v37 = vpop.f32.mrf.mxu0 }
 0x285   :  { %v1495_v41 = vpop.f32.mrf.mxu1  ;;  %v1178_v19 = vpop.f32.mrf.mxu0 }
 0x286   :  { %v1496_v6 = vadd.f32 %v1495_v41, %v1494_v7  ;;  %v1759_v7 = vld [vmem:[#allocation2 + $0x20] sm:$0xff] }
 0x287   :  { %v1497_v8 = vpop.f32.mrf.mxu1  ;;  %v1180_v53 = vpop.f32.mrf.mxu0 }
 0x288   :  { %v1093_v46 = vadd.f32 %v1496_v6, %v2434_v12 }
 0x289   :  { %v1498_v4 = vpop.f32.mrf.mxu1  ;;  %v1182_v32 = vpop.f32.mrf.mxu0 }
 0x28a   :  { %v1499_v49 = vadd.f32 %v1498_v4, %v1497_v8 }
 0x2a4   :  { %v1525_v30 = vpop.f32.mrf.mxu0 }
 0x2a6   :  { %v1526_v11 = vpop.f32.mrf.mxu0 }
 0x2a7   :  { %v1527_v60 = vadd.f32 %v1526_v11, %v1525_v30 }
 0x2a8   :  { %v1528_v27 = vpop.f32.mrf.mxu0 }
 0x2aa   :  { %v1529_v54 = vpop.f32.mrf.mxu0 }
 0x2c3   :  { %v1133_v9 = vpop.f32.mrf.mxu1 }
 0x2c4   :  { %v1134_v59 = vadd.f32 %v1133_v9, %v1009_v51  ;;  %v1530_v51 = vadd.f32 %v1529_v54, %v1528_v27 }
 0x2c5   :  { %v1135_v2 = vpop.f32.mrf.mxu1 }
 0x2c6   :  { %v1177_v10 = vadd.f32 %v1176_v37, %v1134_v59  ;;  %v1136_v55 = vadd.f32 %v1135_v2, %v1011_v1 }
 0x2c7   :  { %v1137_v45 = vpop.f32.mrf.mxu1 }
 0x2c8   :  { %v1267_v14 = vmul.f32 0.020833334, %v1177_v10  ;;  %v1179_v16 = vadd.f32 %v1178_v19, %v1136_v55  ;;  %v1138_v18 = vadd.f32 %v1137_v45, %v1013_v3 }
 0x2c9   :  { %v1139_v20 = vpop.f32.mrf.mxu1 }
 0x2ca   :  { %v1273_v22 = vmax.f32 %v1267_v14, 0.0  ;;  %v1268_v24 = vmul.f32 0.020833334, %v1179_v16  ;;  %v1181_v26 = vadd.f32 %v1180_v53, %v1138_v18  ;;  %v1140_v28 = vadd.f32 %v1139_v20, %v1015_v25  ;;  %v1760_v20 = vld [vmem:[#allocation2 + $0x10] sm:$0xff] }
 0x2cb   :  { %v1309_v16 = vsub.s32 2, %v1300_v52 }
 0x2cc   :  { %v1279_v35 = vadd.f32 1e-05, %v1273_v22  ;;  %v1274_v33 = vmax.f32 %v1268_v24, 0.0  ;;  %v1270_v42 = vmul.f32 0.020833334, %v1181_v26  ;;  %v1183_v21 = vadd.f32 %v1182_v32, %v1140_v28  ;;  %v1761_v28 = vld [vmem:[#allocation2 + $0x28] sm:$0xff] }
 0x2cd   :  { %v1310_v18 = vrot.slane %v1291_v56, %v1309_v16 }
 0x2ce   :  { %1727 = vrsqrt.f32 %v1279_v35  ;;  %v1280_v0 = vadd.f32 1e-05, %v1274_v33  ;;  %v1276_v48 = vmax.f32 %v1270_v42, 0.0  ;;  %v1271_v63 = vmul.f32 0.020833334, %v1183_v21 }
 0x2d0   :  { %1729 = vrsqrt.f32 %v1280_v0  ;;  %v1282_v39 = vadd.f32 1e-05, %v1276_v48  ;;  %v1277_v61 = vmax.f32 %v1271_v63, 0.0 }
 0x2d2   :  { %1731 = vrsqrt.f32 %v1282_v39  ;;  %v1283_v23 = vadd.f32 1e-05, %v1277_v61 }
 0x2d4   :  { %1733 = vrsqrt.f32 %v1283_v23 }
 0x2db   :  { %v1728_v29 = vpop.eup %1727 }
 0x2dc   :  { %v1292_v58 = vmul.f32 %v1728_v29, %v2578_v13  ;;  %v1220_v13 = vadd.f32 %v1527_v60, %v1093_v46 }
 0x2dd   :  { %v1730_v47 = vpop.eup %1729 }
 0x2de   :  { %v1293_v62 = vmul.f32 %v1730_v47, %v2579_v5  ;;  %v1314_v36 = vmul.f32 %v1302_v31, %v1292_v58  ;;  %v1096_v5 = vadd.f32 %v1499_v49, %v2436_v15 }
 0x2df   :  { %v1732_v57 = vpop.eup %1731 }
 0x2e0   :  { %v1295_v17 = vmul.f32 %v1758_v43, %v1732_v57  ;;  %v1315_v40 = vmul.f32 %v1306_v34, %v1293_v62  ;;  %1320 = vst [vmem:[#allocation8] sm:$0xff] %v1314_v36  ;;  %v1223_v8 = vadd.f32 %v1530_v51, %v1096_v5 }
 0x2e1   :  { %v1734_v37 = vpop.eup %1733 }
 0x2e2   :  { %v1296_v41 = vmul.f32 %v1759_v7, %v1734_v37  ;;  %v1317_v19 = vmul.f32 %v1302_v31, %v1295_v17  ;;  %1321 = vst [vmem:[#allocation8 + $0x8] sm:$0xff] %v1315_v40 }
 0x2e3   :  { %v1260_v9 = vpop.f32.mrf.mxu1 }
 0x2e4   :  { %v1261_v1 = vadd.f32 %v1260_v9, %v1220_v13  ;;  %v1318_v59 = vmul.f32 %v1306_v34, %v1296_v41  ;;  %1323 = vst [vmem:[#allocation8 + $0x18] sm:$0xff] %v1317_v19 }
 0x2e5   :  { %v1618_v2 = vpop.f32.mrf.mxu1 }
 0x2e6   :  { %v1269_v12 = vmul.f32 0.020833334, %v1261_v1  ;;  %1324 = vst [vmem:[#allocation8 + $0x20] sm:$0xff] %v1318_v59 }
 0x2e7   :  { %v1263_v4 = vpop.f32.mrf.mxu1 }
 0x2e8   :  { %v1275_v3 = vmax.f32 %v1269_v12, 0.0  ;;  %v1264_v10 = vadd.f32 %v1263_v4, %v1223_v8 }
 0x2e9   :  { %v1619_v55 = vpop.f32.mrf.mxu1 }
 0x2ea   :  { %v1281_v53 = vadd.f32 1e-05, %v1275_v3  ;;  %v1272_v45 = vmul.f32 0.020833334, %v1264_v10 }
 0x2ec   :  { %1735 = vrsqrt.f32 %v1281_v53  ;;  %v1278_v25 = vmax.f32 %v1272_v45, 0.0 }
 0x2ee   :  { %v1284_v14 = vadd.f32 1e-05, %v1278_v25 }
 0x2f0   :  { %1737 = vrsqrt.f32 %v1284_v14 }
 0x2f9   :  { %v1736_v15 = vpop.eup %1735 }
 0x2fa   :  { %v1294_v22 = vmul.f32 %v1760_v20, %v1736_v15 }
 0x2fc   :  { %v1316_v24 = vmul.f32 %v1310_v18, %v1294_v22 }
 0x2fd   :  { %v1738_v26 = vpop.eup %1737 }
 0x2fe   :  { %v1297_v32 = vmul.f32 %v1761_v28, %v1738_v26  ;;  %1322 = vst [vmem:[#allocation8 + $0x10] sm:$0xff] %v1316_v24 }
 0x300   :  { %v1319_v35 = vmul.f32 %v1310_v18, %v1297_v32 }
 0x302   :  { %1325 = vst [vmem:[#allocation8 + $0x28] sm:$0xff] %v1319_v35 }
 0x303   :  { %1833 = shalt.err (!%p1830_p5)
}
 0x304   :  { %1337 = dma.vmem_to_hbm [thread:$0]  %s1332_s2, 768, %s2451_s3, [#allocation4], %s1850_s21, %s1850_s21, %s1851_s22  }
 0x305   :  { %1846 = dma.done.wait [#allocation4], 768  }
 0x306   :  { %1847 = vsyncadd [#allocation4], 4294966528 }
 0x307   :  { %1341 = vsyncpa [#allocation3], 1 }
 0x308   :  { %1342 = vsyncpa [#allocation6], 1 }
 0x309   :  { %1343 = vsyncpa [#allocation4], 1 }

</bundles_post_ra>
